<compile_context>
chip_gen: v7x
topology: tpu7x:2x2x1
jax: 0.10.0
libtpu: 0.0.40
codegen_flags: <defaults>
</compile_context>

<pallas_src>
import functools

import jax
import jax.numpy as jnp
from jax.experimental import pallas as pl
from jax.experimental.pallas import tpu as pltpu

FEAT = 144


def _fuckupnet_kernel(split, x_ref, w_ref, b_feat_ref, dw_ref, db_ref, matrix_ref):
    # x_ref      : [P+C, D_crop+D_mot] bf16   (pre rows first, then cur rows)
    # w_ref      : [D_crop+D_mot, 144] bf16   (stacked crop + motion weights)
    # b_feat_ref : [1, 144]            f32
    # dw_ref     : [144, 2]            bf16   (col0 = w_pre[:,1]-w_pre[:,0],
    #                                          col1 = w_cur[:,1]-w_cur[:,0])
    # db_ref     : [1, 1]              f32    (SMEM scalar: b_cls[1]-b_cls[0])
    # matrix_ref : [P, C]              f32

    # --- fused embedding trunk for pre AND cur in one MXU pass ---
    feats = jnp.maximum(
        jnp.dot(x_ref[...], w_ref[...], preferred_element_type=jnp.float32)
        + b_feat_ref[...],
        0.0,
    )  # [P+C, 144] f32

    # --- single classifier-difference projection ---
    scores = jnp.dot(
        feats.astype(dw_ref.dtype), dw_ref[...],
        preferred_element_type=jnp.float32,
    )  # [P+C, 2] f32
    pre_s = scores[:split, 0:1]   # [P, 1]
    cur_s = scores[split:, 1:2]   # [C, 1]

    # softmax over 2 classes == sigmoid(logit1 - logit0); exp + vrcp go to EUP.
    z = pre_s + cur_s.T + db_ref[0, 0]                      # [P, C]
    matrix_ref[...] = pl.reciprocal(1.0 + jnp.exp(-z), approx=True)


def fuckupnet_forward(pre_crop, cur_crop, pre_motion, cur_motion, params):
    """pre_crop/cur_crop: [N, C, H, W] f32 (NCHW, PyTorch convention).
       pre_motion/cur_motion: [N, D_mot] f32.
       Returns matrix: [pre_num, cur_num] f32."""
    P = pre_crop.shape[0]
    C = cur_crop.shape[0]

    # Trace-time fusions: concat crop+motion per object, stack pre over cur.
    pre_x = jnp.concatenate(
        [pre_crop.reshape(P, -1), pre_motion.reshape(P, -1)], axis=1)
    cur_x = jnp.concatenate(
        [cur_crop.reshape(C, -1), cur_motion.reshape(C, -1)], axis=1)
    x = jnp.concatenate([pre_x, cur_x], axis=0).astype(jnp.bfloat16)

    w = jnp.concatenate(
        [params["w_crop"], params["w_mot"]], axis=0).astype(jnp.bfloat16)
    b_feat = params["b_feat"].astype(jnp.float32)

    # Collapse the 2-class classifier to a single difference projection.
    dw_pre = (params["w_pre"][:, 1] - params["w_pre"][:, 0]).reshape(FEAT, 1)
    dw_cur = (params["w_cur"][:, 1] - params["w_cur"][:, 0]).reshape(FEAT, 1)
    dw = jnp.concatenate([dw_pre, dw_cur], axis=1).astype(jnp.bfloat16)   # [144, 2]
    db = (params["b_cls"][0, 1] - params["b_cls"][0, 0]
          ).reshape(1, 1).astype(jnp.float32)                            # [1, 1]

    vmem = pl.BlockSpec(memory_space=pltpu.MemorySpace.VMEM)
    smem = pl.BlockSpec(memory_space=pltpu.MemorySpace.SMEM)
    out = pl.pallas_call(
        functools.partial(_fuckupnet_kernel, P),
        out_shape=jax.ShapeDtypeStruct((P, C), jnp.float32),
        in_specs=[vmem, vmem, vmem, vmem, smem],
        out_specs=vmem,
    )(x, w, b_feat, dw, db)
    return out


def make_params(d_crop, d_mot, feat=FEAT, seed=42):
    key = jax.random.PRNGKey(seed)
    ks = jax.random.split(key, 6)
    scale_crop = 1.0 / jnp.sqrt(jnp.float32(d_crop))
    scale_mot = 1.0 / jnp.sqrt(jnp.float32(d_mot))
    scale_feat = 1.0 / jnp.sqrt(jnp.float32(feat))
    return {
        "w_crop": jax.random.normal(ks[0], (d_crop, feat), jnp.float32) * scale_crop,
        "w_mot":  jax.random.normal(ks[1], (d_mot, feat), jnp.float32) * scale_mot,
        "b_feat": jax.random.normal(ks[2], (1, feat), jnp.float32) * 0.01,
        "w_pre":  jax.random.normal(ks[3], (feat, 2), jnp.float32) * scale_feat,
        "w_cur":  jax.random.normal(ks[4], (feat, 2), jnp.float32) * scale_feat,
        "b_cls":  jax.random.normal(ks[5], (1, 2), jnp.float32) * 0.01,
    }


if __name__ == "__main__":
    # small deterministic inputs consistent with the forward:
    #   pre/cur crops: [N, 4, 16, 16] (NCHW), motions: [N, 4]
    key = jax.random.PRNGKey(0)
    k1, k2, k3, k4 = jax.random.split(key, 4)
    PRE_N, CUR_N = 4, 4
    CH, H, W = 4, 16, 16
    D_MOT = 4

    pre_crop = jax.random.normal(k1, (PRE_N, CH, H, W), jnp.float32)
    cur_crop = jax.random.normal(k2, (CUR_N, CH, H, W), jnp.float32)
    pre_motion = jax.random.normal(k3, (PRE_N, D_MOT), jnp.float32)
    cur_motion = jax.random.normal(k4, (CUR_N, D_MOT), jnp.float32)

    params = make_params(d_crop=CH * H * W, d_mot=D_MOT)

    matrix = fuckupnet_forward(pre_crop, cur_crop, pre_motion, cur_motion, params)
    jax.block_until_ready(matrix)
    assert matrix.shape == (PRE_N, CUR_N)
    assert bool(jnp.all(jnp.isfinite(matrix)))
    assert bool(jnp.all((matrix >= 0.0) & (matrix <= 1.0)))
    print("KERNEL_OK")
</pallas_src>

<mosaic_0001>
module attributes {stable_mosaic.version = 11 : i64} {
  func.func @_fuckupnet_kernel(%arg0: memref<8x1028xbf16, #tpu.memory_space<vmem>>, %arg1: memref<1028x144xbf16, #tpu.memory_space<vmem>>, %arg2: memref<1x144xf32, #tpu.memory_space<vmem>>, %arg3: memref<144x2xbf16, #tpu.memory_space<vmem>>, %arg4: memref<1x1xf32, #tpu.memory_space<smem>>, %arg5: memref<4x4xf32, #tpu.memory_space<vmem>>) attributes {dimension_semantics = [], scalar_prefetch = 0 : i64, scratch_operands = 0 : i64, tpu.core_type = #tpu.core_type<tc>} {
    %c0 = arith.constant 0 : index
    %c0_0 = arith.constant 0 : index
    %0 = vector.load %arg0[%c0, %c0_0] : memref<8x1028xbf16, #tpu.memory_space<vmem>>, vector<8x1028xbf16>
    %c0_1 = arith.constant 0 : index
    %c0_2 = arith.constant 0 : index
    %1 = vector.load %arg1[%c0_1, %c0_2] : memref<1028x144xbf16, #tpu.memory_space<vmem>>, vector<1028x144xbf16>
    %cst = arith.constant dense<0.000000e+00> : vector<8x144xf32>
    %2 = tpu.matmul %0, %1, %cst {dimension_numbers = #tpu.dot_dimension_numbers<[1], [0], [0], [1], [0, 0, 1, 1], [], []>} : vector<8x1028xbf16>, vector<1028x144xbf16>, vector<8x144xf32> -> vector<8x144xf32>
    %c0_3 = arith.constant 0 : index
    %c0_4 = arith.constant 0 : index
    %3 = vector.load %arg2[%c0_3, %c0_4] : memref<1x144xf32, #tpu.memory_space<vmem>>, vector<1x144xf32>
    %4 = vector.broadcast %3 : vector<1x144xf32> to vector<8x144xf32>
    %5 = arith.addf %2, %4 : vector<8x144xf32>
    %cst_5 = arith.constant 0.000000e+00 : f32
    %6 = vector.broadcast %cst_5 : f32 to vector<8x144xf32>
    %7 = arith.maximumf %5, %6 : vector<8x144xf32>
    %8 = arith.truncf %7 : vector<8x144xf32> to vector<8x144xbf16>
    %c0_6 = arith.constant 0 : index
    %c0_7 = arith.constant 0 : index
    %9 = vector.load %arg3[%c0_6, %c0_7] : memref<144x2xbf16, #tpu.memory_space<vmem>>, vector<144x2xbf16>
    %cst_8 = arith.constant dense<0.000000e+00> : vector<8x2xf32>
    %10 = tpu.matmul %8, %9, %cst_8 {dimension_numbers = #tpu.dot_dimension_numbers<[1], [0], [0], [1], [0, 0, 1, 1], [], []>} : vector<8x144xbf16>, vector<144x2xbf16>, vector<8x2xf32> -> vector<8x2xf32>
    %11 = vector.extract_strided_slice %10 {offsets = [0, 0], sizes = [4, 1], strides = [1, 1]} : vector<8x2xf32> to vector<4x1xf32>
    %12 = vector.extract_strided_slice %10 {offsets = [4, 1], sizes = [4, 1], strides = [1, 1]} : vector<8x2xf32> to vector<4x1xf32>
    %13 = tpu.transpose %12, [1, 0] : vector<4x1xf32> -> vector<1x4xf32>
    %14 = vector.broadcast %11 : vector<4x1xf32> to vector<4x4xf32>
    %15 = vector.broadcast %13 : vector<1x4xf32> to vector<4x4xf32>
    %16 = arith.addf %14, %15 : vector<4x4xf32>
    %c0_9 = arith.constant 0 : index
    %c0_10 = arith.constant 0 : index
    %17 = memref.load %arg4[%c0_9, %c0_10] : memref<1x1xf32, #tpu.memory_space<smem>>
    %18 = vector.broadcast %17 : f32 to vector<4x4xf32>
    %19 = arith.addf %16, %18 : vector<4x4xf32>
    %cst_11 = arith.constant 0.000000e+00 : f32
    %20 = vector.broadcast %cst_11 : f32 to vector<4x4xf32>
    %21 = arith.subf %20, %19 : vector<4x4xf32>
    %22 = math.exp %21 : vector<4x4xf32>
    %cst_12 = arith.constant 1.000000e+00 : f32
    %23 = vector.broadcast %cst_12 : f32 to vector<4x4xf32>
    %24 = arith.addf %23, %22 : vector<4x4xf32>
    %25 = tpu.reciprocal %24 {approx = true} : vector<4x4xf32> -> vector<4x4xf32>
    %c0_13 = arith.constant 0 : index
    %c0_14 = arith.constant 0 : index
    %26 = vector.load %arg5[%c0_13, %c0_14] : memref<4x4xf32, #tpu.memory_space<vmem>>, vector<4x4xf32>
    tpu.vector_store %arg5[%c0_13, %c0_14], %25 {strides = array<i32>} : memref<4x4xf32, #tpu.memory_space<vmem>>, vector<4x4xf32>,
    return
  }
}

</mosaic_0001>

<bundles_post_ra>
// kernel: tpu_custom_call.1
= control target key start
LH: loop header
LB: loop body
LE: loop exit
PB: predicated region body
PF: predicated region fallthrough
CT: control target
= control target key end

     0   :  { %v1663_v8 = vmov 0   ;;  %s2166_s0 = inlined_call_operand.vmem [shape: bf16[8,1028], index: 0, kind: input, shape index: {}]   ;;  %s2167_s1 = inlined_call_operand.vmem [shape: bf16[1028,144], index: 1, kind: input, shape index: {}]   ;;  %s2168_s2 = inlined_call_operand.vmem [shape: f32[1,144], index: 2, kind: input, shape index: {}]   ;;  %s2169_s3 = inlined_call_operand.vmem [shape: bf16[144,2], index: 3, kind: input, shape index: {}]   ;;  %s2170_s4 = inlined_call_operand.<no memory space> [shape: f32[1,1], index: 4, kind: input, shape index: {}]   ;;  %s2171_s5 = inlined_call_operand.hbm [shape: f32[4,4], index: 5, kind: output, shape index: {}]  }
   0x1   :  { %v1423_v0 = vld [vmem:[%s2167_s1 + $0x4] ss:$8 sps:$4 sm:$0xff]   ;;  %v1427_v2 = vld [vmem:[%s2167_s1] ss:$8 sps:$4 sm:$0xff]   ;;  %v1429_v4 = vld [vmem:[%s2167_s1 + $0x14] ss:$8 sps:$4 sm:$0xff]   ;;  %1422 = vset.pattern.permute.xlu0 %v1663_v8 }
   0x2   :  { %v1425_v1 = vld [vmem:[%s2167_s1 + $0x204] ss:$8 sps:$4 sm:$0xff]   ;;  %856 = vmatprep.subr.bf16.mxu1 %v1423_v0  ;;  %v1428_v3 = vld [vmem:[%s2167_s1 + $0x200] ss:$8 sps:$4 sm:$0xff]   ;;  %v1431_v5 = vld [vmem:[%s2167_s1 + $0x214] ss:$8 sps:$4 sm:$0xff]  }
   0x3   :  { %938 = vmatprep.subr.bf16.mxu0 %v1425_v1  ;;  %857 = vmatpush1.bf16.msra.mxu1 %v1427_v2  ;;  %v1433_v6 = vld [vmem:[%s2167_s1 + $0x10] ss:$8 sps:$4 sm:$0xff]   ;;  %v1435_v9 = vld [vmem:[%s2167_s1 + $0x24] ss:$8 sps:$4 sm:$0xff]   ;;  %v1439_v11 = vld [vmem:[%s2167_s1 + $0x20] ss:$8 sps:$4 sm:$0xff]  }
   0x4   :  { %939 = vmatpush1.bf16.msra.mxu0 %v1428_v3  ;;  %858 = vmatprep.subr.bf16.mxu1 %v1429_v4  ;;  %v1434_v7 = vld [vmem:[%s2167_s1 + $0x210] ss:$8 sps:$4 sm:$0xff]   ;;  %v1437_v10 = vld [vmem:[%s2167_s1 + $0x224] ss:$8 sps:$4 sm:$0xff]   ;;  %v1440_v12 = vld [vmem:[%s2167_s1 + $0x220] ss:$8 sps:$4 sm:$0xff]  }
   0x5   :  { %940 = vmatprep.subr.bf16.mxu0 %v1431_v5  ;;  %v1441_v13 = vld [vmem:[%s2167_s1 + $0x34] ss:$8 sps:$4 sm:$0xff]   ;;  %v1445_v15 = vld [vmem:[%s2167_s1 + $0x30] ss:$8 sps:$4 sm:$0xff]   ;;  %v1447_v17 = vld [vmem:[%s2167_s1 + $0x44] ss:$8 sps:$4 sm:$0xff]  }
   0x6   :  { %v1443_v14 = vld [vmem:[%s2167_s1 + $0x234] ss:$8 sps:$4 sm:$0xff]   ;;  %v1446_v16 = vld [vmem:[%s2167_s1 + $0x230] ss:$8 sps:$4 sm:$0xff]   ;;  %v1449_v18 = vld [vmem:[%s2167_s1 + $0x244] ss:$8 sps:$4 sm:$0xff]  }
   0x7   :  { %859 = vmatpush1.bf16.msra.mxu1 %v1433_v6  ;;  %v1451_v19 = vld [vmem:[%s2167_s1 + $0x40] ss:$8 sps:$4 sm:$0xff]   ;;  %v1453_v21 = vld [vmem:[%s2167_s1 + $0x54] ss:$8 sps:$4 sm:$0xff]   ;;  %v1457_v23 = vld [vmem:[%s2167_s1 + $0x50] ss:$8 sps:$4 sm:$0xff]  }
   0x8   :  { %941 = vmatpush1.bf16.msra.mxu0 %v1434_v7  ;;  %860 = vmatprep.subr.bf16.mxu1 %v1435_v9  ;;  %v1452_v20 = vld [vmem:[%s2167_s1 + $0x240] ss:$8 sps:$4 sm:$0xff]   ;;  %v1455_v22 = vld [vmem:[%s2167_s1 + $0x254] ss:$8 sps:$4 sm:$0xff]   ;;  %v1458_v24 = vld [vmem:[%s2167_s1 + $0x250] ss:$8 sps:$4 sm:$0xff]  }
   0x9   :  { %942 = vmatprep.subr.bf16.mxu0 %v1437_v10  ;;  %v1459_v25 = vld [vmem:[%s2167_s1 + $0x64] ss:$8 sps:$4 sm:$0xff]   ;;  %v1463_v27 = vld [vmem:[%s2167_s1 + $0x60] ss:$8 sps:$4 sm:$0xff]   ;;  %v1465_v29 = vld [vmem:[%s2167_s1 + $0x74] ss:$8 sps:$4 sm:$0xff]  }
   0xa   :  { %v1461_v26 = vld [vmem:[%s2167_s1 + $0x264] ss:$8 sps:$4 sm:$0xff]   ;;  %v1464_v28 = vld [vmem:[%s2167_s1 + $0x260] ss:$8 sps:$4 sm:$0xff]   ;;  %v1467_v30 = vld [vmem:[%s2167_s1 + $0x274] ss:$8 sps:$4 sm:$0xff]  }
   0xb   :  { %861 = vmatpush1.bf16.msra.mxu1 %v1439_v11  ;;  %v1469_v31 = vld [vmem:[%s2167_s1 + $0x70] ss:$8 sps:$4 sm:$0xff]   ;;  %v1471_v33 = vld [vmem:[%s2167_s1 + $0x84] ss:$8 sps:$4 sm:$0xff]   ;;  %v1475_v35 = vld [vmem:[%s2167_s1 + $0x80] ss:$8 sps:$4 sm:$0xff]  }
   0xc   :  { %943 = vmatpush1.bf16.msra.mxu0 %v1440_v12  ;;  %862 = vmatprep.subr.bf16.mxu1 %v1441_v13  ;;  %v1470_v32 = vld [vmem:[%s2167_s1 + $0x270] ss:$8 sps:$4 sm:$0xff]   ;;  %v1473_v34 = vld [vmem:[%s2167_s1 + $0x284] ss:$8 sps:$4 sm:$0xff]   ;;  %v1476_v36 = vld [vmem:[%s2167_s1 + $0x280] ss:$8 sps:$4 sm:$0xff]  }
   0xd   :  { %944 = vmatprep.subr.bf16.mxu0 %v1443_v14  ;;  %v1477_v37 = vld [vmem:[%s2167_s1 + $0x94] ss:$8 sps:$4 sm:$0xff]   ;;  %v1481_v39 = vld [vmem:[%s2167_s1 + $0x90] ss:$8 sps:$4 sm:$0xff]   ;;  %v1483_v41 = vld [vmem:[%s2167_s1 + $0xa4] ss:$8 sps:$4 sm:$0xff]  }
   0xe   :  { %v1479_v38 = vld [vmem:[%s2167_s1 + $0x294] ss:$8 sps:$4 sm:$0xff]   ;;  %v1482_v40 = vld [vmem:[%s2167_s1 + $0x290] ss:$8 sps:$4 sm:$0xff]   ;;  %v1485_v42 = vld [vmem:[%s2167_s1 + $0x2a4] ss:$8 sps:$4 sm:$0xff]  }
   0xf   :  { %863 = vmatpush1.bf16.msra.mxu1 %v1445_v15  ;;  %v1487_v43 = vld [vmem:[%s2167_s1 + $0xa0] ss:$8 sps:$4 sm:$0xff]   ;;  %v1489_v45 = vld [vmem:[%s2167_s1 + $0xb4] ss:$8 sps:$4 sm:$0xff]   ;;  %v1493_v48 = vld [vmem:[%s2167_s1 + $0xb0] ss:$8 sps:$4 sm:$0xff]  }
  0x10   :  { %945 = vmatpush1.bf16.msra.mxu0 %v1446_v16  ;;  %864 = vmatprep.subr.bf16.mxu1 %v1447_v17  ;;  %v1488_v44 = vld [vmem:[%s2167_s1 + $0x2a0] ss:$8 sps:$4 sm:$0xff]   ;;  %v1491_v46 = vld [vmem:[%s2167_s1 + $0x2b4] ss:$8 sps:$4 sm:$0xff]   ;;  %v1494_v50 = vld [vmem:[%s2167_s1 + $0x2b0] ss:$8 sps:$4 sm:$0xff]  }
  0x11   :  { %946 = vmatprep.subr.bf16.mxu0 %v1449_v18  ;;  %v23_v47 = vld [vmem:[%s2166_s0] sm:$0xff]  ;;  %v25_v51 = vld [vmem:[%s2166_s0 + $0x10] sm:$0xff] }
  0x12   :  { %v1252_v49 = vcombine.high %v23_v47, %v23_v47  ;;  %v1495_v52 = vld [vmem:[%s2167_s1 + $0xc4] ss:$8 sps:$4 sm:$0xff]   ;;  %v1256_v54 = vcombine.high %v25_v51, %v25_v51  ;;  %v1499_v55 = vld [vmem:[%s2167_s1 + $0xc0] ss:$8 sps:$4 sm:$0xff]   ;;  %v1501_v57 = vld [vmem:[%s2167_s1 + $0xd4] ss:$8 sps:$4 sm:$0xff]   ;;  %v1251_v7 = vcombine.low %v23_v47, %v23_v47  ;;  %v1255_v9 = vcombine.low %v25_v51, %v25_v51 }
  0x13   :  { %865 = vmatpush1.bf16.msra.mxu1 %v1451_v19  ;;  %v1497_v53 = vld [vmem:[%s2167_s1 + $0x2c4] ss:$8 sps:$4 sm:$0xff]   ;;  %v1500_v56 = vld [vmem:[%s2167_s1 + $0x2c0] ss:$8 sps:$4 sm:$0xff]   ;;  %v1503_v58 = vld [vmem:[%s2167_s1 + $0x2d4] ss:$8 sps:$4 sm:$0xff]  }
  0x14   :  { %947 = vmatpush1.bf16.msra.mxu0 %v1452_v20  ;;  %866 = vmatprep.subr.bf16.mxu1 %v1453_v21  ;;  %v1505_v59 = vld [vmem:[%s2167_s1 + $0xd0] ss:$8 sps:$4 sm:$0xff]   ;;  %v1507_v61 = vld [vmem:[%s2167_s1 + $0xe4] ss:$8 sps:$4 sm:$0xff]   ;;  %v1511_v63 = vld [vmem:[%s2167_s1 + $0xe0] ss:$8 sps:$4 sm:$0xff]  }
  0x15   :  { %948 = vmatprep.subr.bf16.mxu0 %v1455_v22  ;;  %888 = vmatprep.mubr.bf16.mxu1 %v1252_v49  ;;  %v1506_v60 = vld [vmem:[%s2167_s1 + $0x2d0] ss:$8 sps:$4 sm:$0xff]   ;;  %v1509_v62 = vld [vmem:[%s2167_s1 + $0x2e4] ss:$8 sps:$4 sm:$0xff]   ;;  %v1512_v0 = vld [vmem:[%s2167_s1 + $0x2e0] ss:$8 sps:$4 sm:$0xff]  }
  0x16   :  { %970 = vmatprep.mubr.bf16.mxu0 %v1256_v54  ;;  %v1513_v1 = vld [vmem:[%s2167_s1 + $0xf4] ss:$8 sps:$4 sm:$0xff]   ;;  %v1517_v3 = vld [vmem:[%s2167_s1 + $0xf0] ss:$8 sps:$4 sm:$0xff]   ;;  %v1523_v5 = vld [vmem:[%s2167_s1 + $0x104] ss:$8 sps:$4 sm:$0xff]  }
  0x17   :  { %867 = vmatpush1.bf16.msra.mxu1 %v1457_v23  ;;  %v1515_v2 = vld [vmem:[%s2167_s1 + $0x2f4] ss:$8 sps:$4 sm:$0xff]   ;;  %v1518_v4 = vld [vmem:[%s2167_s1 + $0x2f0] ss:$8 sps:$4 sm:$0xff]   ;;  %v1528_v6 = vld [vmem:[%s2167_s1 + $0x304] ss:$8 sps:$4 sm:$0xff]  }
  0x18   :  { %949 = vmatpush1.bf16.msra.mxu0 %v1458_v24  ;;  %868 = vmatprep.subr.bf16.mxu1 %v1459_v25  ;;  %v1521_v10 = vld [vmem:[%s2167_s1 + $0x100] ss:$8 sps:$4 sm:$0xff]   ;;  %v1531_v12 = vld [vmem:[%s2167_s1 + $0x114] ss:$8 sps:$4 sm:$0xff]   ;;  %v1529_v14 = vld [vmem:[%s2167_s1 + $0x110] ss:$8 sps:$4 sm:$0xff]  }
  0x19   :  { %950 = vmatprep.subr.bf16.mxu0 %v1461_v26  ;;  %v1526_v11 = vld [vmem:[%s2167_s1 + $0x300] ss:$8 sps:$4 sm:$0xff]   ;;  %v1534_v13 = vld [vmem:[%s2167_s1 + $0x314] ss:$8 sps:$4 sm:$0xff]   ;;  %v1532_v15 = vld [vmem:[%s2167_s1 + $0x310] ss:$8 sps:$4 sm:$0xff]  }
  0x1a   :  { %v1537_v16 = vld [vmem:[%s2167_s1 + $0x124] ss:$8 sps:$4 sm:$0xff]   ;;  %v1535_v18 = vld [vmem:[%s2167_s1 + $0x120] ss:$8 sps:$4 sm:$0xff]   ;;  %v1543_v20 = vld [vmem:[%s2167_s1 + $0x134] ss:$8 sps:$4 sm:$0xff]  }
  0x1b   :  { %869 = vmatpush1.bf16.msra.mxu1 %v1463_v27  ;;  %v1540_v17 = vld [vmem:[%s2167_s1 + $0x324] ss:$8 sps:$4 sm:$0xff]   ;;  %v1538_v19 = vld [vmem:[%s2167_s1 + $0x320] ss:$8 sps:$4 sm:$0xff]   ;;  %v1546_v21 = vld [vmem:[%s2167_s1 + $0x334] ss:$8 sps:$4 sm:$0xff]  }
  0x1c   :  { %951 = vmatpush1.bf16.msra.mxu0 %v1464_v28  ;;  %870 = vmatprep.subr.bf16.mxu1 %v1465_v29  ;;  %v1541_v22 = vld [vmem:[%s2167_s1 + $0x130] ss:$8 sps:$4 sm:$0xff]   ;;  %v1549_v24 = vld [vmem:[%s2167_s1 + $0x144] ss:$8 sps:$4 sm:$0xff]   ;;  %v1547_v26 = vld [vmem:[%s2167_s1 + $0x140] ss:$8 sps:$4 sm:$0xff]  }
  0x1d   :  { %952 = vmatprep.subr.bf16.mxu0 %v1467_v30  ;;  %v1544_v23 = vld [vmem:[%s2167_s1 + $0x330] ss:$8 sps:$4 sm:$0xff]   ;;  %v1552_v25 = vld [vmem:[%s2167_s1 + $0x344] ss:$8 sps:$4 sm:$0xff]   ;;  %v1550_v27 = vld [vmem:[%s2167_s1 + $0x340] ss:$8 sps:$4 sm:$0xff]  }
  0x1e   :  { %v1555_v28 = vld [vmem:[%s2167_s1 + $0x154] ss:$8 sps:$4 sm:$0xff]   ;;  %v1553_v30 = vld [vmem:[%s2167_s1 + $0x150] ss:$8 sps:$4 sm:$0xff]  }
  0x1f   :  { %871 = vmatpush1.bf16.msra.mxu1 %v1469_v31  ;;  %v1558_v29 = vld [vmem:[%s2167_s1 + $0x354] ss:$8 sps:$4 sm:$0xff]   ;;  %v1556_v31 = vld [vmem:[%s2167_s1 + $0x350] ss:$8 sps:$4 sm:$0xff]  }
  0x20   :  { %953 = vmatpush1.bf16.msra.mxu0 %v1470_v32  ;;  %872 = vmatprep.subr.bf16.mxu1 %v1471_v33  ;;  %v1561_v32 = vld [vmem:[%s2167_s1 + $0x164] ss:$8 sps:$4 sm:$0xff]  }
  0x21   :  { %954 = vmatprep.subr.bf16.mxu0 %v1473_v34  ;;  %v1564_v33 = vld [vmem:[%s2167_s1 + $0x364] ss:$8 sps:$4 sm:$0xff]   ;;  %v1559_v34 = vld [vmem:[%s2167_s1 + $0x160] ss:$8 sps:$4 sm:$0xff]  }
  0x23   :  { %873 = vmatpush1.bf16.msra.mxu1 %v1475_v35  ;;  %v1979_v35 = vld [vmem:[%s2166_s0 + $0x8] sm:$0xff] }
  0x24   :  { %955 = vmatpush1.bf16.msra.mxu0 %v1476_v36  ;;  %874 = vmatprep.subr.bf16.mxu1 %v1477_v37  ;;  %v1984_v36 = vld [vmem:[%s2166_s0 + $0x18] sm:$0xff]  ;;  %v1562_v37 = vld [vmem:[%s2167_s1 + $0x360] ss:$8 sps:$4 sm:$0xff]  }
  0x25   :  { %956 = vmatprep.subr.bf16.mxu0 %v1479_v38  ;;  %v1254_v38 = vcombine.high %v1979_v35, %v1979_v35 }
  0x27   :  { %875 = vmatpush1.bf16.msra.mxu1 %v1481_v39  ;;  %v1258_v39 = vcombine.high %v1984_v36, %v1984_v36 }
  0x28   :  { %957 = vmatpush1.bf16.msra.mxu0 %v1482_v40  ;;  %876 = vmatprep.subr.bf16.mxu1 %v1483_v41  ;;  %v1567_v40 = vld [vmem:[%s2167_s1 + $0x174] ss:$8 sps:$4 sm:$0xff]  }
  0x29   :  { %958 = vmatprep.subr.bf16.mxu0 %v1485_v42  ;;  %v1570_v41 = vld [vmem:[%s2167_s1 + $0x374] ss:$8 sps:$4 sm:$0xff]   ;;  %v1565_v42 = vld [vmem:[%s2167_s1 + $0x170] ss:$8 sps:$4 sm:$0xff]  }
  0x2b   :  { %877 = vmatpush1.bf16.msra.mxu1 %v1487_v43  ;;  %v1568_v43 = vld [vmem:[%s2167_s1 + $0x370] ss:$8 sps:$4 sm:$0xff]  }
  0x2c   :  { %959 = vmatpush1.bf16.msra.mxu0 %v1488_v44  ;;  %878 = vmatprep.subr.bf16.mxu1 %v1489_v45  ;;  %v1573_v44 = vld [vmem:[%s2167_s1 + $0x184] ss:$8 sps:$4 sm:$0xff]  }
  0x2d   :  { %960 = vmatprep.subr.bf16.mxu0 %v1491_v46  ;;  %v1576_v45 = vld [vmem:[%s2167_s1 + $0x384] ss:$8 sps:$4 sm:$0xff]  }
  0x2f   :  { %879 = vmatpush1.bf16.msra.mxu1 %v1493_v48 }
  0x30   :  { %961 = vmatpush1.bf16.msra.mxu0 %v1494_v50  ;;  %880 = vmatprep.subr.bf16.mxu1 %v1495_v52 }
  0x31   :  { %962 = vmatprep.subr.bf16.mxu0 %v1497_v53 }
  0x33   :  { %881 = vmatpush1.bf16.msra.mxu1 %v1499_v55 }
  0x34   :  { %963 = vmatpush1.bf16.msra.mxu0 %v1500_v56  ;;  %882 = vmatprep.subr.bf16.mxu1 %v1501_v57 }
  0x35   :  { %964 = vmatprep.subr.bf16.mxu0 %v1503_v58 }
  0x37   :  { %883 = vmatpush1.bf16.msra.mxu1 %v1505_v59 }
  0x38   :  { %965 = vmatpush1.bf16.msra.mxu0 %v1506_v60  ;;  %884 = vmatprep.subr.bf16.mxu1 %v1507_v61 }
  0x39   :  { %966 = vmatprep.subr.bf16.mxu0 %v1509_v62 }
  0x3b   :  { %885 = vmatpush1.bf16.msra.mxu1 %v1511_v63 }
  0x3c   :  { %967 = vmatpush1.bf16.msra.mxu0 %v1512_v0  ;;  %886 = vmatprep.subr.bf16.mxu1 %v1513_v1 }
  0x3d   :  { %968 = vmatprep.subr.bf16.mxu0 %v1515_v2 }
  0x3f   :  { %887 = vmatpush1.bf16.msra.mxu1 %v1517_v3 }
  0x40   :  { %969 = vmatpush1.bf16.msra.mxu0 %v1518_v4  ;;  %897 = vmatprep.subr.bf16.mxu1 %v1523_v5 }
  0x41   :  { %979 = vmatprep.subr.bf16.mxu0 %v1528_v6 }
  0x42   :  { %889 = vmatmul.mubr.bf16.vlgmr.msra.gmra.mrb[0].mxu1 %v1251_v7 }
  0x43   :  { %971 = vmatmul.mubr.bf16.vlgmr.msra.gmra.mrb[0].mxu0 %v1255_v9  ;;  %898 = vmatpush1.bf16.msra.mxu1 %v1521_v10 }
  0x44   :  { %980 = vmatpush1.bf16.msra.mxu0 %v1526_v11  ;;  %899 = vmatprep.subr.bf16.mxu1 %v1531_v12 }
  0x45   :  { %981 = vmatprep.subr.bf16.mxu0 %v1534_v13  ;;  %929 = vmatprep.mubr.bf16.mxu1 %v1254_v38 }
  0x46   :  { %1011 = vmatprep.mubr.bf16.mxu0 %v1258_v39 }
  0x47   :  { %900 = vmatpush1.bf16.msra.mxu1 %v1529_v14 }
  0x48   :  { %982 = vmatpush1.bf16.msra.mxu0 %v1532_v15  ;;  %901 = vmatprep.subr.bf16.mxu1 %v1537_v16 }
  0x49   :  { %983 = vmatprep.subr.bf16.mxu0 %v1540_v17 }
  0x4b   :  { %902 = vmatpush1.bf16.msra.mxu1 %v1535_v18 }
  0x4c   :  { %984 = vmatpush1.bf16.msra.mxu0 %v1538_v19  ;;  %903 = vmatprep.subr.bf16.mxu1 %v1543_v20 }
  0x4d   :  { %985 = vmatprep.subr.bf16.mxu0 %v1546_v21 }
  0x4f   :  { %904 = vmatpush1.bf16.msra.mxu1 %v1541_v22 }
  0x50   :  { %986 = vmatpush1.bf16.msra.mxu0 %v1544_v23  ;;  %905 = vmatprep.subr.bf16.mxu1 %v1549_v24 }
  0x51   :  { %987 = vmatprep.subr.bf16.mxu0 %v1552_v25 }
  0x53   :  { %906 = vmatpush1.bf16.msra.mxu1 %v1547_v26 }
  0x54   :  { %988 = vmatpush1.bf16.msra.mxu0 %v1550_v27  ;;  %907 = vmatprep.subr.bf16.mxu1 %v1555_v28 }
  0x55   :  { %989 = vmatprep.subr.bf16.mxu0 %v1558_v29 }
  0x57   :  { %908 = vmatpush1.bf16.msra.mxu1 %v1553_v30 }
  0x58   :  { %990 = vmatpush1.bf16.msra.mxu0 %v1556_v31  ;;  %909 = vmatprep.subr.bf16.mxu1 %v1561_v32 }
  0x59   :  { %991 = vmatprep.subr.bf16.mxu0 %v1564_v33 }
  0x5b   :  { %910 = vmatpush1.bf16.msra.mxu1 %v1559_v34 }
  0x5c   :  { %992 = vmatpush1.bf16.msra.mxu0 %v1562_v37  ;;  %911 = vmatprep.subr.bf16.mxu1 %v1567_v40 }
  0x5d   :  { %993 = vmatprep.subr.bf16.mxu0 %v1570_v41 }
  0x5e   :  { %11 = vsyncpa [#allocation4], 0  ;;  %v1571_v46 = vld [vmem:[%s2167_s1 + $0x180] ss:$8 sps:$4 sm:$0xff]   ;;  %v1579_v48 = vld [vmem:[%s2167_s1 + $0x194] ss:$8 sps:$4 sm:$0xff]   ;;  %v1253_v16 = vcombine.low %v1979_v35, %v1979_v35  ;;  %v1257_v17 = vcombine.low %v1984_v36, %v1984_v36  ;;  %v159_v29 = vlaneseq }
  0x5f   :  { %912 = vmatpush1.bf16.msra.mxu1 %v1565_v42  ;;  %v1574_v47 = vld [vmem:[%s2167_s1 + $0x380] ss:$8 sps:$4 sm:$0xff]   ;;  %v1582_v49 = vld [vmem:[%s2167_s1 + $0x394] ss:$8 sps:$4 sm:$0xff]   ;;  %v1577_v50 = vld [vmem:[%s2167_s1 + $0x190] ss:$8 sps:$4 sm:$0xff]  }
  0x60   :  { %994 = vmatpush1.bf16.msra.mxu0 %v1568_v43  ;;  %913 = vmatprep.subr.bf16.mxu1 %v1573_v44  ;;  %v1580_v51 = vld [vmem:[%s2167_s1 + $0x390] ss:$8 sps:$4 sm:$0xff]   ;;  %v1585_v52 = vld [vmem:[%s2167_s1 + $0x1a4] ss:$8 sps:$4 sm:$0xff]   ;;  %v1583_v54 = vld [vmem:[%s2167_s1 + $0x1a0] ss:$8 sps:$4 sm:$0xff]  }
  0x61   :  { %995 = vmatprep.subr.bf16.mxu0 %v1576_v45  ;;  %v1588_v53 = vld [vmem:[%s2167_s1 + $0x3a4] ss:$8 sps:$4 sm:$0xff]   ;;  %v1586_v55 = vld [vmem:[%s2167_s1 + $0x3a0] ss:$8 sps:$4 sm:$0xff]   ;;  %v1591_v56 = vld [vmem:[%s2167_s1 + $0x1b4] ss:$8 sps:$4 sm:$0xff]  }
  0x62   :  { %v1594_v57 = vld [vmem:[%s2167_s1 + $0x3b4] ss:$8 sps:$4 sm:$0xff]   ;;  %v1589_v58 = vld [vmem:[%s2167_s1 + $0x1b0] ss:$8 sps:$4 sm:$0xff]   ;;  %v1597_v60 = vld [vmem:[%s2167_s1 + $0x1c4] ss:$8 sps:$4 sm:$0xff]  }
  0x63   :  { %914 = vmatpush1.bf16.msra.mxu1 %v1571_v46  ;;  %v1592_v59 = vld [vmem:[%s2167_s1 + $0x3b0] ss:$8 sps:$4 sm:$0xff]   ;;  %v1600_v61 = vld [vmem:[%s2167_s1 + $0x3c4] ss:$8 sps:$4 sm:$0xff]   ;;  %v1595_v62 = vld [vmem:[%s2167_s1 + $0x1c0] ss:$8 sps:$4 sm:$0xff]  }
  0x64   :  { %996 = vmatpush1.bf16.msra.mxu0 %v1574_v47  ;;  %915 = vmatprep.subr.bf16.mxu1 %v1579_v48  ;;  %v1598_v63 = vld [vmem:[%s2167_s1 + $0x3c0] ss:$8 sps:$4 sm:$0xff]   ;;  %v1603_v0 = vld [vmem:[%s2167_s1 + $0x1d4] ss:$8 sps:$4 sm:$0xff]   ;;  %v1601_v2 = vld [vmem:[%s2167_s1 + $0x1d0] ss:$8 sps:$4 sm:$0xff]  }
  0x65   :  { %997 = vmatprep.subr.bf16.mxu0 %v1582_v49  ;;  %v1606_v1 = vld [vmem:[%s2167_s1 + $0x3d4] ss:$8 sps:$4 sm:$0xff]   ;;  %v1604_v3 = vld [vmem:[%s2167_s1 + $0x3d0] ss:$8 sps:$4 sm:$0xff]   ;;  %v1609_v4 = vld [vmem:[%s2167_s1 + $0x1e4] ss:$8 sps:$4 sm:$0xff]  }
  0x66   :  { %v1612_v5 = vld [vmem:[%s2167_s1 + $0x3e4] ss:$8 sps:$4 sm:$0xff]   ;;  %v1607_v6 = vld [vmem:[%s2167_s1 + $0x1e0] ss:$8 sps:$4 sm:$0xff]   ;;  %v1615_v9 = vld [vmem:[%s2167_s1 + $0x1f4] ss:$8 sps:$4 sm:$0xff]  }
  0x67   :  { %916 = vmatpush1.bf16.msra.mxu1 %v1577_v50  ;;  %v1610_v7 = vld [vmem:[%s2167_s1 + $0x3e0] ss:$8 sps:$4 sm:$0xff]   ;;  %v1618_v10 = vld [vmem:[%s2167_s1 + $0x3f4] ss:$8 sps:$4 sm:$0xff]   ;;  %v1613_v12 = vld [vmem:[%s2167_s1 + $0x1f0] ss:$8 sps:$4 sm:$0xff]  }
  0x68   :  { %998 = vmatpush1.bf16.msra.mxu0 %v1580_v51  ;;  %917 = vmatprep.subr.bf16.mxu1 %v1585_v52  ;;  %v156_v11 = vld [vmem:[%s2167_s1 + $0x400] sm:$0x33]  ;;  %v1616_v13 = vld [vmem:[%s2167_s1 + $0x3f0] ss:$8 sps:$4 sm:$0xff]   ;;  %vm849_vm0 = vcmask 1041408   ;;  %v1627_v20 = vld [vmem:[%s2169_s3 + $0x8] sm:$0xff]  }
  0x69   :  { %999 = vmatprep.subr.bf16.mxu0 %v1588_v53  ;;  %v1389_v14 = vcombine.high %v156_v11, %v156_v11  ;;  %v1388_v15 = vcombine.low %v156_v11, %v156_v11  ;;  %v1626_v19 = vld [vmem:[%s2169_s3] sm:$0xff]   ;;  %v1628_v21 = vld [vmem:[%s2169_s3 + $0x10] sm:$0xff]   ;;  %vm845_vm1 = vcmask 31744   ;;  %v1629_v23 = vld [vmem:[%s2169_s3 + $0x18] sm:$0xff]   ;;  %v160_v30 = vshrl.u32 %v159_v29, 7  ;;  %s1665_s30 = smov [#allocation3]  }
  0x6a   :  { %v1625_v22 = vld [vmem:[%s2166_s0 + $0x20] ss:$0 sps:$4 sm:$0xff]   ;;  %v1631_v25 = vld [vmem:[%s2169_s3 + $0x28] sm:$0xff]   ;;  %v1632_v26 = vld [vmem:[%s2169_s3 + $0x30] sm:$0xff]   ;;  %vm1137_vm2 = vcmask 130048   ;;  %s1243_s6 = sshll.u32 %s1665_s30, 4  ;;  %s1244_s6 = int_to_ptr.vmem [resolvable:$true] %s1243_s6 }
  0x6b   :  { %918 = vmatpush1.bf16.msra.mxu1 %v1583_v54  ;;  %v851_v18 = vsel %vm849_vm0, %v1388_v15, 0  ;;  %v1630_v24 = vld [vmem:[%s2169_s3 + $0x20] sm:$0xff]   ;;  %v1633_v27 = vld [vmem:[%s2169_s3 + $0x38] sm:$0xff]   ;;  %v161_v34 = vsub.s32 0, %v160_v30  ;;  %v165_v37 = vsub.s32 1, %v160_v30  ;;  %vm1235_vm3 = vcmask 27648   ;;  %p1644_p1 = scmp.lt.s32.totalorder %s1244_s6, %s1244_s6 }
  0x6c   :  { %1000 = vmatpush1.bf16.msra.mxu0 %v1586_v55  ;;  %919 = vmatprep.subr.bf16.mxu1 %v1591_v56  ;;  %v1634_v28 = vld [vmem:[%s2169_s3 + $0x40] sm:$0xff]   ;;  %s1639_s7 = scalar_lea.vmem %s1244_s6, 64 }
  0x6d   :  { %1001 = vmatprep.subr.bf16.mxu0 %v1594_v57  ;;  %v157_v36 = vld [vmem:[%s2168_s2] sm:$0x3]  ;;  %s1664_s2 = smov 127   ;;  %p1640_p0 = scmp.ne.s32.totalorder %s1244_s6, %s1639_s7 }
  0x6e   :  { %v162_v38 = vrot.slane %v157_v36, %v161_v34  ;;  %v166_v39 = vrot.slane %v157_v36, %v165_v37  ;;  %p1645_p2 = scmp.lt.s32.totalorder %s1639_s7, %s1639_s7 }
  0x6f   :  { %920 = vmatpush1.bf16.msra.mxu1 %v1589_v58 }
  0x70   :  { %1002 = vmatpush1.bf16.msra.mxu0 %v1592_v59  ;;  %921 = vmatprep.subr.bf16.mxu1 %v1597_v60  ;;  %v1228_v60 = vstv %s2170_s4  ;;  %p1646_p3 = por %p1645_p2, %p1644_p1 }
  0x71   :  { %1003 = vmatprep.subr.bf16.mxu0 %v1600_v61 }
  0x72   :  { %p1647_p4 = pnand %p1646_p3, %p1640_p0 }
  0x73   :  { %922 = vmatpush1.bf16.msra.mxu1 %v1595_v62 }
  0x74   :  { %1004 = vmatpush1.bf16.msra.mxu0 %v1598_v63  ;;  %923 = vmatprep.subr.bf16.mxu1 %v1603_v0 }
  0x75   :  { %1005 = vmatprep.subr.bf16.mxu0 %v1606_v1 }
  0x77   :  { %924 = vmatpush1.bf16.msra.mxu1 %v1601_v2 }
  0x78   :  { %1006 = vmatpush1.bf16.msra.mxu0 %v1604_v3  ;;  %925 = vmatprep.subr.bf16.mxu1 %v1609_v4 }
  0x79   :  { %1007 = vmatprep.subr.bf16.mxu0 %v1612_v5 }
  0x7b   :  { %926 = vmatpush1.bf16.msra.mxu1 %v1607_v6 }
  0x7c   :  { %1008 = vmatpush1.bf16.msra.mxu0 %v1610_v7  ;;  %927 = vmatprep.subr.bf16.mxu1 %v1615_v9 }
  0x7d   :  { %1009 = vmatprep.subr.bf16.mxu0 %v1618_v10 }
  0x7f   :  { %928 = vmatpush1.bf16.msra.mxu1 %v1613_v12 }
  0x80   :  { %1010 = vmatpush1.bf16.msra.mxu0 %v1616_v13  ;;  %1141 = vmatprep.subr.bf16.mxu1 %v1663_v8 }
  0x81   :  { %1390 = vmatprep.subr.msk.bf16.mxu0 %vm849_vm0, %v1389_v14 }
  0x82   :  { %930 = vmatmul.mubr.bf16.vlgmr.msra.gmra.mrb[0].mxu1 %v1253_v16 }
  0x83   :  { %1012 = vmatmul.mubr.bf16.vlgmr.msra.gmra.mrb[0].mxu0 %v1257_v17  ;;  %1142 = vmatpush1.bf16.msra.mxu1 %v1626_v19 }
  0x84   :  { %1021 = vmatpush1.bf16.msra.mxu0 %v851_v18  ;;  %1052 = vmatprep.mubr.bf16.mxu0 %v1663_v8 }
  0x85   :  { %1143 = vmatprep.subr.bf16.mxu1 %v1663_v8 }
  0x87   :  { %1144 = vmatpush1.bf16.msra.mxu1 %v1627_v20 }
  0x88   :  { %1145 = vmatprep.subr.bf16.mxu1 %v1663_v8 }
  0x8b   :  { %1146 = vmatpush1.bf16.msra.mxu1 %v1628_v21 }
  0x8c   :  { %1147 = vmatprep.subr.bf16.mxu1 %v1663_v8 }
  0x8f   :  { %1391 = vmatmul.mubr.msk.bf16.vlgmr.msra.gmra.mrb[0].mxu0 %vm845_vm1, %v1625_v22  ;;  %1148 = vmatpush1.bf16.msra.mxu1 %v1629_v23 }
  0x90   :  { %1149 = vmatprep.subr.bf16.mxu1 %v1663_v8 }
  0x93   :  { %1150 = vmatpush1.bf16.msra.mxu1 %v1630_v24 }
  0x94   :  { %1151 = vmatprep.subr.bf16.mxu1 %v1663_v8 }
  0x97   :  { %1152 = vmatpush1.bf16.msra.mxu1 %v1631_v25 }
  0x98   :  { %1153 = vmatprep.subr.bf16.mxu1 %v1663_v8 }
  0x9b   :  { %1154 = vmatpush1.bf16.msra.mxu1 %v1632_v26 }
  0x9c   :  { %1155 = vmatprep.subr.bf16.mxu1 %v1663_v8 }
  0x9f   :  { %1156 = vmatpush1.bf16.msra.mxu1 %v1633_v27 }
  0xa0   :  { %1157 = vmatprep.subr.bf16.mxu1 %v1663_v8 }
  0xa3   :  { %1158 = vmatpush1.bf16.msra.mxu1 %v1634_v28 }
 0x155   :  { %v931_v31 = vpop.f32.mrb[0].mxu1 }
 0x156   :  { %v933_v32 = vpop.f32.mrb[1].mxu1  ;;  %v1402_v8 = vadd.f32 %v931_v31, %v162_v38 }
 0x157   :  { %v935_v33 = vpop.f32.mrb[2].mxu1  ;;  %v1404_v40 = vadd.f32 %v933_v32, %v166_v39 }
 0x158   :  { %v936_v35 = vpop.f32.mrb[3].mxu1 }
 0x162   :  { %v1054_v41 = vpop.f32.mrb[0].mxu0 }
 0x163   :  { %v1403_v42 = vadd.f32 %v1402_v8, %v1054_v41  ;;  %v1056_v43 = vpop.f32.mrb[1].mxu0 }
 0x164   :  { %v1405_v44 = vadd.f32 %v1404_v40, %v1056_v43  ;;  %v1058_v45 = vpop.f32.mrb[2].mxu0 }
 0x165   :  { %v1061_v46 = vmax.f32 %v1403_v42, 0.0  ;;  %v1059_v47 = vpop.f32.mrb[3].mxu0 }
 0x166   :  { %v1062_v48 = vmax.f32 %v1405_v44, 0.0 }
 0x167   :  { %v1063_v50 = vpack.c.bf16 %v1061_v46, %v1061_v46 }
 0x168   :  { %v1064_v49 = vpack.c.bf16 %v1062_v48, %v1062_v48 }
 0x16a   :  { %1401 = vmatprep.mubr.msk.bf16.mxu1 %vm1137_vm2, %v1064_v49 }
 0x16b   :  { %1174 = vmatmul.mubr.bf16.vlgmr.msra.gmra.mrb[4].mxu1 %v1063_v50 }
 0x23e   :  { %v1175_v51 = vpop.f32.mrb[4].mxu1 }
 0x23f   :  { %v1177_v52 = vpop.f32.mrb[5].mxu1  ;;  %v1182_v53 = vrot.slane %v1175_v51, 4 }
 0x240   :  { %v1178_v54 = vpop.f32.mrb[6].mxu1 }
 0x241   :  { %1183 = vrot.lane.b32.xlu0 %v1182_v53, %s1664_s2  ;;  %v1179_v55 = vpop.f32.mrb[7].mxu1 }
 0x245   :  { %1219 = vperm.xlu0 %1422, %v1175_v51  }
 0x2b3   :  { %v1184_v56 = vpop.permute.xlu0 %1183 }
 0x2b4   :  { %1186 = vxpose.xlu1.b32.start.end [1/1] (short) (narrow) %v1184_v56, 8 }
 0x2c4   :  { %v1220_v59 = vpop.permute.xlu0 %1219 }
 0x334   :  { %v1202_v57 = vpop.trf.xlu1 }
 0x335   :  { %v1225_v58 = vrot.slane %v1202_v57, %v161_v34 }
 0x337   :  { %v1226_v61 = vadd.f32 %v1225_v58, %v1220_v59 }
 0x339   :  { %v1229_v62 = vadd.f32 %v1228_v60, %v1226_v61 }
 0x33b   :  { %v1230_v63 = vsub.f32 0.0, %v1229_v62 }
 0x33d   :  { %v1231_v0 = vmul.f32 1.442695, %v1230_v63 }
 0x33f   :  { %1635 = vpow2.f32 %v1231_v0 }
 0x349   :  { %v1636_v1 = vpop.eup %1635 }
 0x34a   :  { %v1233_v2 = vadd.f32 1.0, %v1636_v1 }
 0x34c   :  { %1637 = vrcp.f32 %v1233_v2 }
 0x356   :  { %v1638_v3 = vpop.eup %1637 }
 0x357   :  { %1236 = vst.msk [vmem:[#allocation3] sm:$0xf] %vm1235_vm3, %v1638_v3 }
 0x358   :  { %1650 = shalt.err (!%p1647_p4)
}
 0x359   :  { %s1651_s9 = scalar_lea.hbm %s2171_s5, 64 }
 0x35a   :  { %p1652_p5 = scmp.ne.s32.totalorder %s2171_s5, %s1651_s9  ;;  %p1655_p6 = scmp.lt.u32.totalorder %s1651_s9, %s2171_s5 }
 0x35c   :  { %p1657_p7 = pnand %p1655_p6, %p1652_p5 }
 0x35e   :  { %1660 = shalt.err (!%p1657_p7)
}
 0x35f   :  { %1246 = dma.vmem_to_hbm [thread:$0]  %s1244_s6, 64, %s2171_s5, [#allocation4]  }
 0x360   :  { %1661 = dma.done.wait [#allocation4], 64  }
 0x361   :  { %1662 = vsyncadd [#allocation4], 4294967232 }
 0x362   :  { %1250 = vsyncpa [#allocation4], 1 }

</bundles_post_ra>
